<compile_context>
chip_gen: v7x
topology: tpu7x:2x2x1
jax: 0.10.0
libtpu: 0.0.40
codegen_flags: <defaults>
</compile_context>

<pallas_src>
import jax
import jax.numpy as jnp
import numpy as np
from jax.experimental import pallas as pl
from jax.experimental.pallas import tpu as pltpu


# ----------------------------------------------------------------------------------------------
# Kernel 1: per-sentence, step-invariant encoder projection  enc_proj = encoder_out @ W_enc^T
# ----------------------------------------------------------------------------------------------
def _enc_proj_kernel(enc_ref, w_ref, o_ref):
    o_ref[...] = jnp.dot(enc_ref[...], w_ref[...], preferred_element_type=jnp.float32)


@jax.jit
def precompute_enc_proj(encoder_out, W_enc):
    """Computed once per encoded sentence (NOT per decoded token); pre-flattened in the wrapper."""
    S, B, H = encoder_out.shape
    flat = encoder_out.reshape(S * B, H)
    out = pl.pallas_call(
        _enc_proj_kernel,
        out_shape=jax.ShapeDtypeStruct((S * B, H), jnp.float32),
        in_specs=[pl.BlockSpec(memory_space=pltpu.MemorySpace.VMEM)] * 2,
        out_specs=pl.BlockSpec(memory_space=pltpu.MemorySpace.VMEM),
    )(flat, jnp.transpose(W_enc))
    return out.reshape(S, B, H)


# ----------------------------------------------------------------------------------------------
# Kernel 2: per-step decoder core (embedding gather + attention + fused-gate 2-layer GRU)
# ----------------------------------------------------------------------------------------------
def decoder_core_kernel(
    tok_ref,                                        # (B,) int32, SMEM (scalar prefetch)
    emb_hbm_ref,                                    # (V, E) f32, stays in HBM
    enc_ref, encp_ref, hid_ref,                     # (S,B,H), (S,B,H), (L,B,H) f32
    w_dec_ref, v_att_ref,                           # (H,H), (1,H) f32
    w_ih0_e_ref, w_ih0_c_ref, w_hh0_ref, b0_ref,    # (E,3H) (H,3H) (H,3H) bf16, (2,1,3H) f32
    w_ih1_ref, w_hh1_ref, b1_ref,                   # (H,3H) (H,3H) bf16, (2,1,3H) f32
    new_hid_ref, alpha_ref, feat_ref,               # out: (L,B,H) f32, (B,S) f32, (B,2H) bf16
    emb_buf, dma_sems,                              # scratch: (B,E) f32 VMEM, (B,) DMA sems
):
    f32, bf16 = jnp.float32, jnp.bfloat16
    S, B, H = enc_ref.shape
    L = hid_ref.shape[0]

    # ---- embedding gather: DMA only the B selected rows of the HBM table (no one-hot) ----
    row_copies = []
    for b in range(B):
        cp = pltpu.make_async_copy(emb_hbm_ref.at[pl.ds(tok_ref[b], 1)],
                                   emb_buf.at[pl.ds(b, 1)],
                                   dma_sems.at[b])
        cp.start()
        row_copies.append(cp)

    # ---- Bahdanau attention (enc_proj precomputed; math overlaps with the embedding DMAs) ----
    dec_proj = jnp.dot(hid_ref[L - 1], w_dec_ref[...], preferred_element_type=f32)    # (B,H)
    scores = jnp.tanh(encp_ref[...] + dec_proj[None, :, :])                            # (S,B,H)
    beta = jnp.sum(scores * v_att_ref[...][None], axis=2)                              # (S,B)
    m = jnp.max(beta, axis=0, keepdims=True)
    e = jnp.exp(beta - m)
    alpha = e * pl.reciprocal(jnp.sum(e, axis=0, keepdims=True), approx=True)          # (S,B)
    context = jnp.sum(alpha[:, :, None] * enc_ref[...], axis=0)                        # (B,H)
    alpha_ref[...] = jnp.transpose(alpha)                                              # (B,S) lane-dense

    for cp in row_copies:
        cp.wait()
    embedded = emb_buf[...]                                                            # (B,E)

    # ---- fused-gate GRU cell: one (in,3H) GEMM per matrix; gate columns are [r | z | n] ----
    def gru_cell(gi, h, w_hh_ref, b_hh):
        gh = jnp.dot(h.astype(bf16), w_hh_ref[...], preferred_element_type=f32) + b_hh
        r = jax.nn.sigmoid(gi[:, :H] + gh[:, :H])
        z = jax.nn.sigmoid(gi[:, H:2 * H] + gh[:, H:2 * H])
        n = jnp.tanh(gi[:, 2 * H:] + r * gh[:, 2 * H:])
        return (1.0 - z) * n + z * h

    # layer 0: input = cat([embedded, context]) -> keep the E/H row split, fused gate columns
    gi0 = (jnp.dot(embedded.astype(bf16), w_ih0_e_ref[...], preferred_element_type=f32)
           + jnp.dot(context.astype(bf16), w_ih0_c_ref[...], preferred_element_type=f32)
           + b0_ref[0])
    h0_new = gru_cell(gi0, hid_ref[0], w_hh0_ref, b0_ref[1])

    # TODO(synk): nn.GRU inter-layer dropout (p=0.2) is train-mode only; eval forward is identity.
    gi1 = jnp.dot(h0_new.astype(bf16), w_ih1_ref[...], preferred_element_type=f32) + b1_ref[0]
    h1_new = gru_cell(gi1, hid_ref[1], w_hh1_ref, b1_ref[1])

    new_hid_ref[0] = h0_new
    new_hid_ref[1] = h1_new
    feat_ref[...] = jnp.concatenate([h1_new, context], axis=1).astype(feat_ref.dtype)  # (B,2H)


# ----------------------------------------------------------------------------------------------
# Kernel 3: output projection Linear(2H -> V), tiled over V (streamed weights, lane-dense store)
# ----------------------------------------------------------------------------------------------
def out_proj_kernel(feat_ref, w_ref, b_ref, logits_ref):
    logits_ref[...] = (jnp.dot(feat_ref[...], w_ref[...], preferred_element_type=jnp.float32)
                       + b_ref[...])


@jax.jit
def decoder_forward(tokens, encoder_out, enc_proj, decoder_hidden, p):
    """tokens: (1,B) int; encoder_out/enc_proj: (S,B,H) f32; decoder_hidden: (L,B,H) f32."""
    S, B, H = encoder_out.shape
    L = decoder_hidden.shape[0]
    V, E = p["embed"].shape
    f32, bf16 = jnp.float32, jnp.bfloat16

    # --- glue: torch weight layouts -> matmul-ready (in, out) layouts, gates fused to width 3H ---
    w_dec = jnp.transpose(p["W_dec"])                      # (H, H)
    v_att = p["V_att"]                                     # (1, H)

    def gru_layout(w_ih, w_hh, b_ih, b_hh):
        # torch GRU weights are (3H, in) with gates stacked [r; z; n]  ->  (in, 3H) bf16
        return (jnp.transpose(w_ih).astype(bf16),
                jnp.transpose(w_hh).astype(bf16),
                jnp.stack([b_ih, b_hh]).reshape(2, 1, 3 * H).astype(f32))

    w_ih0, w_hh0, b0 = gru_layout(p["w_ih_l0"], p["w_hh_l0"], p["b_ih_l0"], p["b_hh_l0"])
    w_ih0_e, w_ih0_c = w_ih0[:E], w_ih0[E:]                # split cat([emb, ctx]) input rows
    w_ih1, w_hh1, b1 = gru_layout(p["w_ih_l1"], p["w_hh_l1"], p["b_ih_l1"], p["b_hh_l1"])

    w_out = jnp.transpose(p["out_w"]).astype(bf16)         # (2H, V)
    b_out = p["out_b"].reshape(1, V).astype(f32)

    tok = tokens.reshape(B).astype(jnp.int32)              # scalar-prefetch tokens (SMEM)

    vmem = pl.BlockSpec(memory_space=pltpu.MemorySpace.VMEM)
    hbm = pl.BlockSpec(memory_space=pl.ANY)

    new_hidden, alpha_bs, feat = pl.pallas_call(
        decoder_core_kernel,
        out_shape=(
            jax.ShapeDtypeStruct((L, B, H), f32),
            jax.ShapeDtypeStruct((B, S), f32),             # lane-dense alpha
            jax.ShapeDtypeStruct((B, 2 * H), bf16),        # cat([rnn_out, context]) for the proj
        ),
        grid_spec=pltpu.PrefetchScalarGridSpec(
            num_scalar_prefetch=1,
            grid=(1,),
            in_specs=[hbm] + [vmem] * 12,
            out_specs=(vmem, vmem, vmem),
            scratch_shapes=[pltpu.VMEM((B, E), f32),
                            pltpu.SemaphoreType.DMA((B,))],
        ),
        # decoder_hidden (arg index 4, counting the scalar-prefetch arg) -> new_hidden, in place
        input_output_aliases={4: 0},
        compiler_params=pltpu.CompilerParams(
            dimension_semantics=("arbitrary",),
            vmem_limit_bytes=32 * 1024 * 1024),
    )(tok, p["embed"], encoder_out, enc_proj, decoder_hidden,
      w_dec, v_att, w_ih0_e, w_ih0_c, w_hh0, b0, w_ih1, w_hh1, b1)

    # --- output projection tiled over V; "parallel" axis uses both TensorCores on v7x ---
    tile_v = V                                             # fallback: whole V if not 128-aligned
    for t in (512, 256, 128):
        if V % t == 0:
            tile_v = t
            break
    logits = pl.pallas_call(
        out_proj_kernel,
        out_shape=jax.ShapeDtypeStruct((B, V), f32),
        grid=(V // tile_v,),
        in_specs=[pl.BlockSpec((B, 2 * H), lambda j: (0, 0)),
                  pl.BlockSpec((2 * H, tile_v), lambda j: (0, j)),
                  pl.BlockSpec((1, tile_v), lambda j: (0, j))],
        out_specs=pl.BlockSpec((B, tile_v), lambda j: (0, j)),
        compiler_params=pltpu.CompilerParams(
            dimension_semantics=("parallel",),
            vmem_limit_bytes=32 * 1024 * 1024),
    )(feat, w_out, b_out)

    # torch shapes: (1,B,V), (L,B,H), alpha.permute(2,1,0) == (1,B,S) (already lane-dense)
    return logits[None, :, :], new_hidden, alpha_bs[None, :, :]


# ----------------------------------------------------------------------------------------------
# Pure-JAX mirror of the PyTorch forward, for correctness checking
# ----------------------------------------------------------------------------------------------
def reference_forward(tokens, encoder_out, decoder_hidden, p):
    H = encoder_out.shape[2]
    emb = p["embed"][tokens]                                   # (1, B, E)
    enc = encoder_out @ p["W_enc"].T
    dec = decoder_hidden[-1:] @ p["W_dec"].T
    beta = jnp.tanh(enc + dec) @ p["V_att"].T                  # (S, B, 1)
    alpha = jax.nn.softmax(beta, axis=0)
    context = jnp.sum(alpha * encoder_out, axis=0)[None]       # (1, B, H)
    alpha_out = jnp.transpose(alpha, (2, 1, 0))

    def gru(x, h, w_ih, w_hh, b_ih, b_hh):
        gi = x @ w_ih.T + b_ih
        gh = h @ w_hh.T + b_hh
        i_r, i_z, i_n = gi[:, :H], gi[:, H:2 * H], gi[:, 2 * H:]
        h_r, h_z, h_n = gh[:, :H], gh[:, H:2 * H], gh[:, 2 * H:]
        r = jax.nn.sigmoid(i_r + h_r)
        z = jax.nn.sigmoid(i_z + h_z)
        n = jnp.tanh(i_n + r * h_n)
        return (1.0 - z) * n + z * h

    x0 = jnp.concatenate([emb, context], axis=2)[0]
    h0 = gru(x0, decoder_hidden[0], p["w_ih_l0"], p["w_hh_l0"], p["b_ih_l0"], p["b_hh_l0"])
    h1 = gru(h0, decoder_hidden[1], p["w_ih_l1"], p["w_hh_l1"], p["b_ih_l1"], p["b_hh_l1"])
    out = jnp.concatenate([h1[None], context], axis=2) @ p["out_w"].T + p["out_b"]
    return out, jnp.stack([h0, h1]), alpha_out


if __name__ == "__main__":
    # small shapes consistent with the module (hp scaled down); V chosen so the V-grid has 2 tiles
    S, B, H, E, V, L = 8, 8, 32, 32, 1024, 2

    key = jax.random.PRNGKey(0)
    ks = jax.random.split(key, 20)
    init = lambda k, shape: 0.1 * jax.random.normal(k, shape, dtype=jnp.float32)

    params = {
        "embed":  init(ks[0], (V, E)).at[0].set(0.0),   # padding_idx = 0
        "W_enc":  init(ks[1], (H, H)),
        "W_dec":  init(ks[2], (H, H)),
        "V_att":  init(ks[3], (1, H)),
        "w_ih_l0": init(ks[4], (3 * H, E + H)),
        "w_hh_l0": init(ks[5], (3 * H, H)),
        "b_ih_l0": init(ks[6], (3 * H,)),
        "b_hh_l0": init(ks[7], (3 * H,)),
        "w_ih_l1": init(ks[8], (3 * H, H)),
        "w_hh_l1": init(ks[9], (3 * H, H)),
        "b_ih_l1": init(ks[10], (3 * H,)),
        "b_hh_l1": init(ks[11], (3 * H,)),
        "out_w":  init(ks[12], (V, 2 * H)),
        "out_b":  init(ks[13], (V,)),
    }

    tokens = jax.random.randint(ks[14], (1, B), 0, V)                 # one decoding frame
    encoder_out = jax.random.normal(ks[15], (S, B, H), dtype=jnp.float32)
    decoder_hidden = jax.random.normal(ks[16], (L, B, H), dtype=jnp.float32)

    # step-invariant: computed once per source sentence, reused for every decoded token
    enc_proj = precompute_enc_proj(encoder_out, params["W_enc"])

    logits, new_hidden, alpha = decoder_forward(tokens, encoder_out, enc_proj,
                                                decoder_hidden, params)
    jax.block_until_ready((logits, new_hidden, alpha))

    r_logits, r_hidden, r_alpha = reference_forward(tokens, encoder_out, decoder_hidden, params)
    np.testing.assert_allclose(np.asarray(logits), np.asarray(r_logits), rtol=5e-2, atol=5e-2)
    np.testing.assert_allclose(np.asarray(new_hidden), np.asarray(r_hidden), rtol=5e-2, atol=5e-2)
    np.testing.assert_allclose(np.asarray(alpha), np.asarray(r_alpha), rtol=5e-2, atol=5e-2)

    print("KERNEL_OK")
</pallas_src>

<mosaic_0001>
module attributes {stable_mosaic.version = 11 : i64} {
  func.func @_enc_proj_kernel(%arg0: memref<64x32xf32, #tpu.memory_space<vmem>>, %arg1: memref<32x32xf32, #tpu.memory_space<vmem>>, %arg2: memref<64x32xf32, #tpu.memory_space<vmem>>) attributes {dimension_semantics = [], scalar_prefetch = 0 : i64, scratch_operands = 0 : i64, tpu.core_type = #tpu.core_type<tc>} {
    %c0 = arith.constant 0 : index
    %c0_0 = arith.constant 0 : index
    %0 = vector.load %arg0[%c0, %c0_0] : memref<64x32xf32, #tpu.memory_space<vmem>>, vector<64x32xf32>
    %c0_1 = arith.constant 0 : index
    %c0_2 = arith.constant 0 : index
    %1 = vector.load %arg1[%c0_1, %c0_2] : memref<32x32xf32, #tpu.memory_space<vmem>>, vector<32x32xf32>
    %cst = arith.constant dense<0.000000e+00> : vector<64x32xf32>
    %2 = tpu.matmul %0, %1, %cst {dimension_numbers = #tpu.dot_dimension_numbers<[1], [0], [0], [1], [0, 0, 1, 1], [], []>} : vector<64x32xf32>, vector<32x32xf32>, vector<64x32xf32> -> vector<64x32xf32>
    %c0_3 = arith.constant 0 : index
    %c0_4 = arith.constant 0 : index
    %3 = vector.load %arg2[%c0_3, %c0_4] : memref<64x32xf32, #tpu.memory_space<vmem>>, vector<64x32xf32>
    tpu.vector_store %arg2[%c0_3, %c0_4], %2 {strides = array<i32>} : memref<64x32xf32, #tpu.memory_space<vmem>>, vector<64x32xf32>,
    return
  }
}

</mosaic_0001>

<bundles_post_ra>
// kernel: precompute_enc_proj.1
= control target key start
LH: loop header
LB: loop body
LE: loop exit
PB: predicated region body
PF: predicated region fallthrough
CT: control target
= control target key end

     0   :  { %vm24_vm0 = vcmask 261120   ;;  %s339_s0 = inlined_call_operand.vmem [shape: f32[64,32], index: 0, kind: input, shape index: {}]   ;;  %s340_s1 = inlined_call_operand.vmem [shape: f32[32,32], index: 1, kind: input, shape index: {}]   ;;  %s341_s2 = inlined_call_operand.hbm [shape: f32[64,32], index: 2, kind: output, shape index: {}]  }
   0x1   :  { %v20_v0 = vld [vmem:[%s340_s1] sm:$0xff]  ;;  %v21_v1 = vld [vmem:[%s340_s1 + $0x8] sm:$0xff]  ;;  %v22_v2 = vld [vmem:[%s340_s1 + $0x10] sm:$0xff] }
   0x2   :  { %v218_v3 = vpack.c.bf16 %v21_v1, %v20_v0  ;;  %v23_v4 = vld [vmem:[%s340_s1 + $0x18] sm:$0xff]  ;;  %v12_v5 = vld [vmem:[%s339_s0] sm:$0xff] }
   0x3   :  { %v16_v6 = vld [vmem:[%s339_s0 + $0x20] sm:$0xff]  ;;  %v222_v7 = vpack.c.bf16 %v23_v4, %v22_v2  ;;  %206 = vmatprep.mubr.msk.f32.mxu0 %vm24_vm0, %v12_v5 }
   0x4   :  { %212 = vmatprep.mubr.msk.f32.mxu1 %vm24_vm0, %v16_v6  ;;  %219 = vmatprep.subr.bf16.mxu0 %v218_v3 }
   0x5   :  { %226 = vmatprep.subr.bf16.mxu1 %v218_v3  ;;  %221 = vmatpush3.bf16.msra.mxu0 %v218_v3 }
   0x6   :  { %228 = vmatpush3.bf16.msra.mxu1 %v218_v3 }
   0x7   :  { %7 = vsyncpa [#allocation3], 0  ;;  %223 = vmatprep.subr.bf16.mxu0 %v222_v7  ;;  %227 = vmatprep.subr.bf16.mxu1 %v222_v7  ;;  %v13_v8 = vld [vmem:[%s339_s0 + $0x8] sm:$0xff]  ;;  %v14_v10 = vld [vmem:[%s339_s0 + $0x10] sm:$0xff]  ;;  %s257_s4 = smov [#allocation2]  }
   0x8   :  { %v17_v9 = vld [vmem:[%s339_s0 + $0x28] sm:$0xff]  ;;  %v18_v11 = vld [vmem:[%s339_s0 + $0x30] sm:$0xff]  ;;  %v15_v12 = vld [vmem:[%s339_s0 + $0x18] sm:$0xff]  ;;  %s167_s5 = sshll.u32 %s257_s4, 4  ;;  %s168_s5 = int_to_ptr.vmem [resolvable:$true] %s167_s5 }
   0x9   :  { %225 = vmatpush3.bf16.msra.mxu0 %v222_v7  ;;  %v19_v13 = vld [vmem:[%s339_s0 + $0x38] sm:$0xff]  ;;  %s233_s0 = scalar_lea.vmem %s168_s5, 1024  ;;  %p238_p1 = scmp.lt.s32.totalorder %s168_s5, %s168_s5 }
   0xa   :  { %229 = vmatpush3.bf16.msra.mxu1 %v222_v7  ;;  %p234_p0 = scmp.ne.s32.totalorder %s168_s5, %s233_s0  ;;  %p239_p2 = scmp.lt.s32.totalorder %s233_s0, %s233_s0 }
   0xc   :  { %207 = vmatmul.mubr.msk.f32.vlgmr.msra.gmra.mrb[0].mxu0 %vm24_vm0, %v13_v8  ;;  %p240_p3 = por %p239_p2, %p238_p1 }
   0xd   :  { %213 = vmatmul.mubr.msk.f32.vlgmr.msra.gmra.mrb[0].mxu1 %vm24_vm0, %v17_v9  ;;  %209 = vmatprep.mubr.msk.f32.mxu0 %vm24_vm0, %v14_v10 }
   0xe   :  { %215 = vmatprep.mubr.msk.f32.mxu1 %vm24_vm0, %v18_v11  ;;  %p241_p4 = pnand %p240_p3, %p234_p0 }
  0x10   :  { %210 = vmatmul.mubr.msk.f32.gmra.mrb[2].mxu0 %vm24_vm0, %v15_v12 }
  0x11   :  { %216 = vmatmul.mubr.msk.f32.gmra.mrb[2].mxu1 %vm24_vm0, %v19_v13 }
  0xdf   :  { %v208_v14 = vpop.f32.mrb[0].mxu0 }
  0xe0   :  { %v214_v15 = vpop.f32.mrb[0].mxu1  ;;  %155 = vst.msk [vmem:[#allocation2 + $0x8] sm:$0xff] %vm24_vm0, %v208_v14  ;;  %v115_v16 = vpop.f32.mrb[1].mxu0 }
  0xe1   :  { %159 = vst.msk [vmem:[#allocation2 + $0x28] sm:$0xff] %vm24_vm0, %v214_v15  ;;  %v135_v17 = vpop.f32.mrb[1].mxu1  ;;  %154 = vst.msk [vmem:[#allocation2] sm:$0xff] %vm24_vm0, %v115_v16 }
  0xe2   :  { %158 = vst.msk [vmem:[#allocation2 + $0x20] sm:$0xff] %vm24_vm0, %v135_v17 }
  0xe3   :  { %v211_v18 = vpop.f32.mrb[2].mxu0 }
  0xe4   :  { %v217_v19 = vpop.f32.mrb[2].mxu1  ;;  %157 = vst.msk [vmem:[#allocation2 + $0x18] sm:$0xff] %vm24_vm0, %v211_v18  ;;  %v125_v20 = vpop.f32.mrb[3].mxu0 }
  0xe5   :  { %161 = vst.msk [vmem:[#allocation2 + $0x38] sm:$0xff] %vm24_vm0, %v217_v19  ;;  %v145_v21 = vpop.f32.mrb[3].mxu1  ;;  %156 = vst.msk [vmem:[#allocation2 + $0x10] sm:$0xff] %vm24_vm0, %v125_v20 }
  0xe6   :  { %160 = vst.msk [vmem:[#allocation2 + $0x30] sm:$0xff] %vm24_vm0, %v145_v21 }
  0xe7   :  { %244 = shalt.err (!%p241_p4)
}
  0xe8   :  { %s245_s8 = scalar_lea.hbm %s341_s2, 1024 }
  0xe9   :  { %p246_p5 = scmp.ne.s32.totalorder %s341_s2, %s245_s8  ;;  %p249_p6 = scmp.lt.u32.totalorder %s245_s8, %s341_s2 }
  0xeb   :  { %p251_p7 = pnand %p249_p6, %p246_p5 }
  0xed   :  { %254 = shalt.err (!%p251_p7)
}
  0xee   :  { %s258_s13 = smov 128   ;;  %s259_s14 = smov 8  }
  0xef   :  { %173 = dma.vmem_to_hbm [thread:$0]  %s168_s5, 1024, %s341_s2, [#allocation3], %s258_s13, %s258_s13, %s259_s14  }
  0xf0   :  { %255 = dma.done.wait [#allocation3], 1024  }
  0xf1   :  { %256 = vsyncadd [#allocation3], 4294966272 }
  0xf2   :  { %177 = vsyncpa [#allocation3], 1 }

</bundles_post_ra>
